<compile_context>
chip_gen: v7x
topology: tpu7x:2x2x1
jax: 0.10.0
libtpu: 0.0.40
codegen_flags: <defaults>
</compile_context>

<pallas_src>
import functools
import math

import jax
import jax.numpy as jnp
from jax.experimental import pallas as pl
from jax.experimental.pallas import tpu as pltpu

LANE = 128  # TPU lane width: hidden/output feature dims are padded to this.


def _round_up(n, m):
    return ((n + m - 1) // m) * m


def _resident_spec(block_shape, index_map, *, single_buffer):
    """BlockSpec for a grid-invariant operand; single-buffer it when useful."""
    if single_buffer:
        try:
            return pl.BlockSpec(block_shape, index_map,
                                pipeline_mode=pl.Buffered(1))
        except (AttributeError, TypeError):
            pass  # older JAX without pipeline_mode/Buffered
    return pl.BlockSpec(block_shape, index_map)


def _fused_mlp_kernel(x_ref, w0_ref, w_ref, b_ref, o_ref, *, num_layers, classes):
    """One batch tile through the whole MLP; activations never leave VMEM/vregs.

    x_ref : (TB, Din)       unpadded input tile (f32)
    w0_ref: (Din, DP)       first-layer weight, already in MXU dtype (bf16)
    w_ref : (Lr, DP, DP)    remaining stacked weights, MXU dtype (bf16)
    b_ref : (L, DP)         stacked biases, f32 (zero in pad lanes)
    o_ref : (TB, classes)   unpadded output tile (f32)
    """
    mxu_dtype = w0_ref.dtype
    biases = b_ref[...]                                    # (L, DP) f32

    # Layer 0: K = true input width (no input padding needed).
    y = jnp.dot(x_ref[...].astype(mxu_dtype), w0_ref[...],
                preferred_element_type=jnp.float32)
    y = y + biases[0:1, :]

    # Hidden layers (static unroll -> straight-line VLIW schedule).
    for l in range(1, num_layers):
        h = jnp.maximum(y, 0.0)                            # ReLU (VPU, f32)
        y = jnp.dot(h.astype(mxu_dtype), w_ref[l - 1],
                    preferred_element_type=jnp.float32)
        y = y + biases[l:l + 1, :]

    # Final activation: Softplus (beta=1, threshold=20), like nn.Softplus.
    out = jnp.where(y > 20.0, y,
                    jnp.log1p(jnp.exp(jnp.minimum(y, 20.0))))  # EUP
    o_ref[...] = out[:, :classes].astype(o_ref.dtype)


def fused_mlp(x, w0, w_stack, b_stack, classes, *, tile_b=512):
    """Run the fused MLP.  x: (B, Din) unpadded; returns (B, classes) f32."""
    x = x.astype(jnp.float32)
    B, din = x.shape
    L, DP = b_stack.shape

    # Batch tile: multiple of 8 sublanes; small batches collapse to grid=(1,).
    TB = min(tile_b, _round_up(B, 8))
    Bp = _round_up(B, TB)
    if Bp != B:
        x = jnp.pad(x, ((0, Bp - B), (0, 0)))   # row pad only (no lane pad)
    n_tiles = Bp // TB

    flops = 2 * Bp * (din * DP + (L - 1) * DP * DP)
    bytes_accessed = int(
        x.size * x.dtype.itemsize
        + w0.size * w0.dtype.itemsize
        + w_stack.size * w_stack.dtype.itemsize
        + b_stack.size * b_stack.dtype.itemsize
        + Bp * classes * 4)
    cost = pl.CostEstimate(flops=flops,
                           transcendentals=2 * Bp * DP,
                           bytes_accessed=bytes_accessed)

    kernel = functools.partial(_fused_mlp_kernel, num_layers=L, classes=classes)
    multi = n_tiles > 1

    out = pl.pallas_call(
        kernel,
        out_shape=jax.ShapeDtypeStruct((Bp, classes), jnp.float32),
        grid=(n_tiles,),
        in_specs=[
            pl.BlockSpec((TB, din), lambda i: (i, 0)),            # x batch tile
            _resident_spec((din, DP), lambda i: (0, 0),           # layer-0 W
                           single_buffer=multi),
            _resident_spec((w_stack.shape[0], DP, DP),            # stacked W
                           lambda i: (0, 0, 0), single_buffer=multi),
            _resident_spec((L, DP), lambda i: (0, 0),             # stacked b
                           single_buffer=multi),
        ],
        out_specs=pl.BlockSpec((TB, classes), lambda i: (i, 0)),
        compiler_params=pltpu.CompilerParams(
            dimension_semantics=("parallel",) if multi else ("arbitrary",)),
        cost_estimate=cost,
    )(x, w0, w_stack, b_stack)

    return out[:B] if Bp != B else out


class ClassifierPallas:
    """JAX/Pallas equivalent of the PyTorch Classifier module (fused forward)."""

    def __init__(self, classifier_dims, classes, key, *,
                 param_dtype=jnp.bfloat16):
        dims = list(classifier_dims)
        L = len(dims)                       # number of Linear layers (as in PyTorch)
        self.num_layers = L
        self.classes = classes

        in_dims = dims
        out_dims = dims[1:] + [classes]
        DP = _round_up(max(out_dims), LANE)   # common padded hidden/output width
        Lr = max(L - 1, 1)

        self.params = []                      # unpadded f32, for the reference
        w0 = jnp.zeros((in_dims[0], DP), param_dtype)
        w_rest = jnp.zeros((Lr, DP, DP), param_dtype)
        b_stack = jnp.zeros((L, DP), jnp.float32)
        for i in range(L):
            din, dout = in_dims[i], out_dims[i]
            key, kw, kb = jax.random.split(key, 3)
            bound = 1.0 / math.sqrt(din)      # PyTorch nn.Linear default init
            w = jax.random.uniform(kw, (din, dout), jnp.float32, -bound, bound)
            b = jax.random.uniform(kb, (dout,), jnp.float32, -bound, bound)
            self.params.append((w, b))
            if i == 0:
                w0 = w0.at[:, :dout].set(w.astype(param_dtype))
            else:
                w_rest = w_rest.at[i - 1, :din, :dout].set(w.astype(param_dtype))
            b_stack = b_stack.at[i, :dout].set(b)

        self.w0 = w0
        self.w_rest = w_rest
        self.b_stack = b_stack

    def __call__(self, x):
        return fused_mlp(x, self.w0, self.w_rest, self.b_stack, self.classes)


def _reference_forward(params, x, compute_dtype=jnp.float32):
    """Pure-JAX reference (unpadded).  compute_dtype = matmul operand dtype."""
    h = x.astype(jnp.float32)
    n = len(params)
    for i, (w, b) in enumerate(params):
        y = jnp.dot(h.astype(compute_dtype), w.astype(compute_dtype),
                    preferred_element_type=jnp.float32) + b
        if i < n - 1:
            h = jnp.maximum(y, 0.0)
        else:
            h = jnp.where(y > 20.0, y, jnp.log1p(jnp.exp(jnp.minimum(y, 20.0))))
    return h


if __name__ == "__main__":
    key = jax.random.PRNGKey(0)
    key, k_in, k_model = jax.random.split(key, 3)

    # Small shapes consistent with the module: classifier_dims=[32, 64, 32],
    # 10 classes, batch=16  ->  linears 32->64->32->10.
    classifier_dims = [32, 64, 32]
    classes = 10
    batch = 16

    x = jax.random.normal(k_in, (batch, classifier_dims[0]), jnp.float32)

    model = ClassifierPallas(classifier_dims, classes, k_model)   # bf16 weights
    out = jax.block_until_ready(model(x))
    assert out.shape == (batch, classes), out.shape

    # Tight check vs a reference that mimics the kernel math (bf16 operands,
    # f32 accumulation), loose check vs the exact f32 PyTorch-style math.
    ref_bf16 = _reference_forward(model.params, x, jnp.bfloat16)
    ref_f32 = _reference_forward(model.params, x, jnp.float32)
    assert jnp.allclose(out, ref_bf16, atol=1e-3, rtol=1e-3), "mismatch (bf16 ref)"
    assert jnp.allclose(out, ref_f32, atol=5e-2, rtol=5e-2), "mismatch (f32 ref)"

    print("KERNEL_OK")
</pallas_src>

<mosaic_0001>
module attributes {stable_mosaic.version = 11 : i64} {
  func.func @_fused_mlp_kernel(%arg0: i32, %arg1: memref<16x32xf32, #tpu.memory_space<vmem>>, %arg2: memref<32x128xbf16, #tpu.memory_space<vmem>>, %arg3: memref<2x128x128xbf16, #tpu.memory_space<vmem>>, %arg4: memref<3x128xf32, #tpu.memory_space<vmem>>, %arg5: memref<16x10xf32, #tpu.memory_space<vmem>>) attributes {dimension_semantics = [#tpu.dimension_semantics<arbitrary>], iteration_bounds = array<i64: 1>, scalar_prefetch = 0 : i64, scratch_operands = 0 : i64, tpu.core_type = #tpu.core_type<tc>, window_params = [{transform_indices = @transform_0, window_bounds = array<i64: 16, 32>}, {pipeline_mode = #tpu.pipeline_mode<synchronous>, transform_indices = @transform_1, window_bounds = array<i64: 32, 128>}, {pipeline_mode = #tpu.pipeline_mode<synchronous>, transform_indices = @transform_2, window_bounds = array<i64: 2, 128, 128>}, {pipeline_mode = #tpu.pipeline_mode<synchronous>, transform_indices = @transform_3, window_bounds = array<i64: 3, 128>}, {transform_indices = @transform_4, window_bounds = array<i64: 16, 10>}]} {
    %c0 = arith.constant 0 : index
    %c0_0 = arith.constant 0 : index
    %0 = vector.load %arg4[%c0, %c0_0] : memref<3x128xf32, #tpu.memory_space<vmem>>, vector<3x128xf32>
    %c0_1 = arith.constant 0 : index
    %c0_2 = arith.constant 0 : index
    %1 = vector.load %arg1[%c0_1, %c0_2] : memref<16x32xf32, #tpu.memory_space<vmem>>, vector<16x32xf32>
    %2 = arith.truncf %1 : vector<16x32xf32> to vector<16x32xbf16>
    %c0_3 = arith.constant 0 : index
    %c0_4 = arith.constant 0 : index
    %3 = vector.load %arg2[%c0_3, %c0_4] : memref<32x128xbf16, #tpu.memory_space<vmem>>, vector<32x128xbf16>
    %cst = arith.constant dense<0.000000e+00> : vector<16x128xf32>
    %4 = tpu.matmul %2, %3, %cst {dimension_numbers = #tpu.dot_dimension_numbers<[1], [0], [0], [1], [0, 0, 1, 1], [], []>} : vector<16x32xbf16>, vector<32x128xbf16>, vector<16x128xf32> -> vector<16x128xf32>
    %5 = vector.extract_strided_slice %0 {offsets = [0, 0], sizes = [1, 128], strides = [1, 1]} : vector<3x128xf32> to vector<1x128xf32>
    %6 = vector.broadcast %5 : vector<1x128xf32> to vector<16x128xf32>
    %7 = arith.addf %4, %6 : vector<16x128xf32>
    %cst_5 = arith.constant 0.000000e+00 : f32
    %8 = vector.broadcast %cst_5 : f32 to vector<16x128xf32>
    %9 = arith.maximumf %7, %8 : vector<16x128xf32>
    %10 = arith.truncf %9 : vector<16x128xf32> to vector<16x128xbf16>
    %c0_6 = arith.constant 0 : index
    %c0_7 = arith.constant 0 : index
    %c0_8 = arith.constant 0 : index
    %11 = vector.load %arg3[%c0_6, %c0_7, %c0_8] : memref<2x128x128xbf16, #tpu.memory_space<vmem>>, vector<1x128x128xbf16>
    %12 = vector.shape_cast %11 : vector<1x128x128xbf16> to vector<128x128xbf16>
    %cst_9 = arith.constant dense<0.000000e+00> : vector<16x128xf32>
    %13 = tpu.matmul %10, %12, %cst_9 {dimension_numbers = #tpu.dot_dimension_numbers<[1], [0], [0], [1], [0, 0, 1, 1], [], []>} : vector<16x128xbf16>, vector<128x128xbf16>, vector<16x128xf32> -> vector<16x128xf32>
    %14 = vector.extract_strided_slice %0 {offsets = [1, 0], sizes = [1, 128], strides = [1, 1]} : vector<3x128xf32> to vector<1x128xf32>
    %15 = vector.broadcast %14 : vector<1x128xf32> to vector<16x128xf32>
    %16 = arith.addf %13, %15 : vector<16x128xf32>
    %cst_10 = arith.constant 0.000000e+00 : f32
    %17 = vector.broadcast %cst_10 : f32 to vector<16x128xf32>
    %18 = arith.maximumf %16, %17 : vector<16x128xf32>
    %19 = arith.truncf %18 : vector<16x128xf32> to vector<16x128xbf16>
    %c1 = arith.constant 1 : index
    %c0_11 = arith.constant 0 : index
    %c0_12 = arith.constant 0 : index
    %20 = vector.load %arg3[%c1, %c0_11, %c0_12] : memref<2x128x128xbf16, #tpu.memory_space<vmem>>, vector<1x128x128xbf16>
    %21 = vector.shape_cast %20 : vector<1x128x128xbf16> to vector<128x128xbf16>
    %cst_13 = arith.constant dense<0.000000e+00> : vector<16x128xf32>
    %22 = tpu.matmul %19, %21, %cst_13 {dimension_numbers = #tpu.dot_dimension_numbers<[1], [0], [0], [1], [0, 0, 1, 1], [], []>} : vector<16x128xbf16>, vector<128x128xbf16>, vector<16x128xf32> -> vector<16x128xf32>
    %23 = vector.extract_strided_slice %0 {offsets = [2, 0], sizes = [1, 128], strides = [1, 1]} : vector<3x128xf32> to vector<1x128xf32>
    %24 = vector.broadcast %23 : vector<1x128xf32> to vector<16x128xf32>
    %25 = arith.addf %22, %24 : vector<16x128xf32>
    %cst_14 = arith.constant 2.000000e+01 : f32
    %26 = vector.broadcast %cst_14 : f32 to vector<16x128xf32>
    %27 = arith.cmpf ogt, %25, %26 : vector<16x128xf32>
    %cst_15 = arith.constant 2.000000e+01 : f32
    %28 = vector.broadcast %cst_15 : f32 to vector<16x128xf32>
    %29 = arith.minimumf %25, %28 : vector<16x128xf32>
    %30 = math.exp %29 : vector<16x128xf32>
    %31 = math.log1p %30 : vector<16x128xf32>
    %32 = arith.select %27, %25, %31 : vector<16x128xi1>, vector<16x128xf32>
    %33 = vector.extract_strided_slice %32 {offsets = [0, 0], sizes = [16, 10], strides = [1, 1]} : vector<16x128xf32> to vector<16x10xf32>
    %c0_16 = arith.constant 0 : index
    %c0_17 = arith.constant 0 : index
    %34 = vector.load %arg5[%c0_16, %c0_17] : memref<16x10xf32, #tpu.memory_space<vmem>>, vector<16x10xf32>
    tpu.vector_store %arg5[%c0_16, %c0_17], %33 {strides = array<i32>} : memref<16x10xf32, #tpu.memory_space<vmem>>, vector<16x10xf32>,
    return
  }
  func.func @transform_0(%arg0: i32) -> (i32, i32) {
    %c0_i32 = arith.constant 0 : i32
    %c0_i32_0 = arith.constant 0 : i32
    return %arg0, %c0_i32 : i32, i32
  }
  func.func @transform_1(%arg0: i32) -> (i32, i32) {
    %c0_i32 = arith.constant 0 : i32
    %c0_i32_0 = arith.constant 0 : i32
    %c0_i32_1 = arith.constant 0 : i32
    return %c0_i32, %c0_i32_0 : i32, i32
  }
  func.func @transform_2(%arg0: i32) -> (i32, i32, i32) {
    %c0_i32 = arith.constant 0 : i32
    %c0_i32_0 = arith.constant 0 : i32
    %c0_i32_1 = arith.constant 0 : i32
    %c0_i32_2 = arith.constant 0 : i32
    return %c0_i32, %c0_i32_0, %c0_i32_1 : i32, i32, i32
  }
  func.func @transform_3(%arg0: i32) -> (i32, i32) {
    %c0_i32 = arith.constant 0 : i32
    %c0_i32_0 = arith.constant 0 : i32
    %c0_i32_1 = arith.constant 0 : i32
    return %c0_i32, %c0_i32_0 : i32, i32
  }
  func.func @transform_4(%arg0: i32) -> (i32, i32) {
    %c0_i32 = arith.constant 0 : i32
    %c0_i32_0 = arith.constant 0 : i32
    return %arg0, %c0_i32 : i32, i32
  }
}

</mosaic_0001>

<bundles_post_ra>
// kernel: tpu_custom_call.1
= control target key start
LH: loop header
LB: loop body
LE: loop exit
PB: predicated region body
PF: predicated region fallthrough
CT: control target
= control target key end

     0   :  { %9 = vsyncpa [#allocation3], 0  ;;  %s743_s0 = inlined_call_operand.hbm [shape: f32[16,32], index: 0, kind: input, shape index: {}]   ;;  %s744_s1 = inlined_call_operand.hbm [shape: bf16[32,128], index: 1, kind: input, shape index: {}]   ;;  %s745_s2 = inlined_call_operand.hbm [shape: bf16[2,128,128], index: 2, kind: input, shape index: {}]   ;;  %s746_s3 = inlined_call_operand.vmem [shape: f32[3,128], index: 3, kind: input, shape index: {}]   ;;  %s747_s4 = inlined_call_operand.hbm [shape: f32[16,10], index: 4, kind: output, shape index: {}]  }
   0x1   :  { %10 = vsyncpa [#allocation6], 0 }
   0x2   :  { %11 = vsyncpa [#allocation4], 0  ;;  %s621_s15 = smov [#allocation5]   ;;  %s527_s19 = scalar_lea.hbm %s744_s1, 256 }
   0x3   :  { %s29_s16 = sshll.u32 %s621_s15, 4  ;;  %p528_p0 = scmp.ne.s32.totalorder %s744_s1, %s527_s19  ;;  %s30_s16 = int_to_ptr.vmem [resolvable:$true] %s29_s16 }
   0x4   :  { %p531_p1 = scmp.lt.u32.totalorder %s527_s19, %s744_s1 }
   0x6   :  { %p533_p2 = pnand %p531_p1, %p528_p0 }
   0x8   :  { %536 = shalt.err (!%p533_p2)
}
   0x9   :  { %s537_s24 = scalar_lea.vmem %s30_s16, 256  ;;  %p542_p4 = scmp.lt.s32.totalorder %s30_s16, %s30_s16 }
   0xa   :  { %p538_p3 = scmp.ne.s32.totalorder %s30_s16, %s537_s24  ;;  %p543_p5 = scmp.lt.s32.totalorder %s537_s24, %s537_s24 }
   0xc   :  { %p544_p6 = por %p543_p5, %p542_p4 }
   0xe   :  { %p545_p7 = pnand %p544_p6, %p538_p3 }
  0x10   :  { %548 = shalt.err (!%p545_p7)
}
  0x11   :  { %s622_s25 = smov 64   ;;  %s623_s26 = smov 4  }
  0x12   :  { %35 = dma.hbm_to_vmem [thread:$0]  %s744_s1, 256, %s30_s16, [#allocation6], %s622_s25, %s622_s25, %s623_s26  }
  0x13   :  { %s624_s29 = smov [#allocation2]   ;;  %s549_s7 = scalar_lea.hbm %s743_s0, 256 }
  0x14   :  { %s17_s30 = sshll.u32 %s624_s29, 4  ;;  %p550_p8 = scmp.ne.s32.totalorder %s743_s0, %s549_s7  ;;  %s18_s30 = int_to_ptr.vmem [resolvable:$true] %s17_s30 }
  0x15   :  { %p553_p9 = scmp.lt.u32.totalorder %s549_s7, %s743_s0 }
  0x17   :  { %p555_p10 = pnand %p553_p9, %p550_p8 }
  0x19   :  { %558 = shalt.err (!%p555_p10)
}
  0x1a   :  { %s559_s12 = scalar_lea.vmem %s18_s30, 256  ;;  %p564_p12 = scmp.lt.s32.totalorder %s18_s30, %s18_s30 }
  0x1b   :  { %p560_p11 = scmp.ne.s32.totalorder %s18_s30, %s559_s12  ;;  %p565_p13 = scmp.lt.s32.totalorder %s559_s12, %s559_s12 }
  0x1d   :  { %p566_p0 = por %p565_p13, %p564_p12 }
  0x1f   :  { %p567_p1 = pnand %p566_p0, %p560_p11 }
  0x21   :  { %570 = shalt.err (!%p567_p1)
}
  0x22   :  { %s625_s1 = smov 128   ;;  %s626_s13 = smov 8  }
  0x23   :  { %23 = dma.hbm_to_vmem [thread:$0]  %s743_s0, 256, %s18_s30, [#allocation3], %s625_s1, %s625_s1, %s626_s13  }
  0x24   :  { %s627_s16 = smov [#allocation7]   ;;  %s571_s20 = scalar_lea.hbm %s745_s2, 2048 }
  0x25   :  { %s41_s17 = sshll.u32 %s627_s16, 4  ;;  %p572_p2 = scmp.ne.s32.totalorder %s745_s2, %s571_s20  ;;  %s42_s17 = int_to_ptr.vmem [resolvable:$true] %s41_s17 }
  0x26   :  { %p575_p3 = scmp.lt.u32.totalorder %s571_s20, %s745_s2 }
  0x28   :  { %p577_p4 = pnand %p575_p3, %p572_p2 }
  0x2a   :  { %580 = shalt.err (!%p577_p4)
}
  0x2b   :  { %s581_s27 = scalar_lea.vmem %s42_s17, 2048  ;;  %p586_p6 = scmp.lt.s32.totalorder %s42_s17, %s42_s17 }
  0x2c   :  { %p582_p5 = scmp.ne.s32.totalorder %s42_s17, %s581_s27  ;;  %p587_p7 = scmp.lt.s32.totalorder %s581_s27, %s581_s27 }
  0x2e   :  { %p588_p8 = por %p587_p7, %p586_p6 }
  0x30   :  { %p589_p9 = pnand %p588_p8, %p582_p5 }
  0x32   :  { %592 = shalt.err (!%p589_p9)
}
  0x33   :  { %47 = dma.hbm_to_vmem [thread:$0]  %s745_s2, 2048, %s42_s17, [#allocation6], %s622_s25, %s622_s25, %s623_s26  }
  0x34   :  { %615 = dma.done.wait [#allocation3], 256  }
  0x35   :  { %616 = vsyncadd [#allocation3], 4294967040 }
  0x36   :  { %617 = dma.done.wait [#allocation6], 2304  }
  0x37   :  { %618 = vsyncadd [#allocation6], 4294964992  ;;  %v628_v0 = vmov 0.0   ;;  %vm629_vm0 = vmmov 0   ;;  %v501_v1 = vld [vmem:[#allocation5] sm:$0xff]   ;;  %v502_v2 = vld [vmem:[#allocation5 + $0x8] sm:$0xff]   ;;  %v68_v20 = vlaneseq }
  0x38   :  { %443 = vmatprep.subr.bf16.mxu0 %v628_v0  ;;  %447 = vmatprep.mubr.msk.bf16.mxu0 %vm629_vm0, %v628_v0  ;;  %v61_v3 = vld [vmem:[#allocation2] sm:$0xff]  ;;  %v62_v4 = vld [vmem:[#allocation2 + $0x8] sm:$0xff]  ;;  %vm84_vm1 = vcmask 261120   ;;  %v505_v8 = vld [vmem:[#allocation7 + $0x10] sm:$0xff]   ;;  %vm382_vm3 = vcmask 80896  }
  0x39   :  { %451 = vmatprep.subr.bf16.mxu1 %v628_v0  ;;  %467 = vmatprep.mubr.msk.bf16.mxu1 %vm629_vm0, %v628_v0  ;;  %v503_v5 = vld [vmem:[#allocation7] sm:$0xff]   ;;  %v63_v6 = vpack.c.bf16 %v62_v4, %v61_v3  ;;  %v504_v7 = vld [vmem:[#allocation7 + $0x8] sm:$0xff]   ;;  %v506_v9 = vld [vmem:[#allocation7 + $0x18] sm:$0xff]   ;;  %v69_v21 = vshrl.u32 %v68_v20, 7 }
  0x3a   :  { %444 = vmatpush3.bf16.msra.mxu0 %v501_v1  ;;  %452 = vmatpush3.bf16.msra.mxu1 %v503_v5  ;;  %v507_v10 = vld [vmem:[#allocation7 + $0x20] sm:$0xff]   ;;  %v508_v11 = vld [vmem:[#allocation7 + $0x28] sm:$0xff]   ;;  %v509_v12 = vld [vmem:[#allocation7 + $0x30] sm:$0xff]  }
  0x3b   :  { %445 = vmatprep.subr.bf16.mxu0 %v628_v0  ;;  %453 = vmatprep.subr.bf16.mxu1 %v628_v0  ;;  %v510_v13 = vld [vmem:[#allocation7 + $0x38] sm:$0xff]   ;;  %v511_v14 = vld [vmem:[#allocation7 + $0x40] sm:$0xff]   ;;  %v512_v15 = vld [vmem:[#allocation7 + $0x48] sm:$0xff]   ;;  %v70_v22 = vsub.s32 0, %v69_v21  ;;  %v150_v36 = vsub.s32 1, %v69_v21  ;;  %v263_v47 = vsub.s32 2, %v69_v21 }
  0x3c   :  { %v513_v16 = vld [vmem:[#allocation7 + $0x50] sm:$0xff]   ;;  %v514_v17 = vld [vmem:[#allocation7 + $0x58] sm:$0xff]   ;;  %v515_v18 = vld [vmem:[#allocation7 + $0x60] sm:$0xff]  }
  0x3d   :  { %v516_v19 = vld [vmem:[#allocation7 + $0x68] sm:$0xff]   ;;  %v60_v23 = vld [vmem:[%s746_s3] sm:$0x7]  ;;  %v517_v34 = vld [vmem:[#allocation7 + $0x70] sm:$0xff]   ;;  %s630_s3 = smov [#allocation8]  }
  0x3e   :  { %446 = vmatpush3.bf16.msra.mxu0 %v502_v2  ;;  %454 = vmatpush3.bf16.msra.mxu1 %v504_v7  ;;  %v71_v24 = vrot.slane %v60_v23, %v70_v22  ;;  %v518_v35 = vld [vmem:[#allocation7 + $0x78] sm:$0xff]   ;;  %v151_v37 = vrot.slane %v60_v23, %v150_v36  ;;  %v264_v48 = vrot.slane %v60_v23, %v263_v47  ;;  %s390_s26 = sshll.u32 %s630_s3, 4  ;;  %s391_s26 = int_to_ptr.vmem [resolvable:$true] %s390_s26 }
  0x3f   :  { %471 = vmatprep.subr.bf16.mxu0 %v628_v0  ;;  %455 = vmatprep.subr.bf16.mxu1 %v628_v0  ;;  %s593_s29 = scalar_lea.vmem %s391_s26, 256  ;;  %p598_p11 = scmp.lt.s32.totalorder %s391_s26, %s391_s26 }
  0x40   :  { %p594_p10 = scmp.ne.s32.totalorder %s391_s26, %s593_s29  ;;  %p599_p12 = scmp.lt.s32.totalorder %s593_s29, %s593_s29 }
  0x41   :  { %448 = vmatmul.mubr.msk.bf16.vlgmr.msra.gmra.mrb[0].mxu0 %vm84_vm1, %v63_v6 }
  0x42   :  { %487 = vmatprep.mubr.msk.bf16.mxu0 %vm629_vm0, %v628_v0  ;;  %456 = vmatpush3.bf16.msra.mxu1 %v505_v8  ;;  %p600_p13 = por %p599_p12, %p598_p11 }
  0x43   :  { %457 = vmatprep.subr.bf16.mxu1 %v628_v0  ;;  %472 = vmatpush3.bf16.msra.mxu0 %v511_v14 }
  0x44   :  { %473 = vmatprep.subr.bf16.mxu0 %v628_v0  ;;  %p601_p0 = pnand %p600_p13, %p594_p10 }
  0x46   :  { %458 = vmatpush3.bf16.msra.mxu1 %v506_v9 }
  0x47   :  { %459 = vmatprep.subr.bf16.mxu1 %v628_v0  ;;  %474 = vmatpush3.bf16.msra.mxu0 %v512_v15 }
  0x48   :  { %475 = vmatprep.subr.bf16.mxu0 %v628_v0 }
  0x4a   :  { %460 = vmatpush3.bf16.msra.mxu1 %v507_v10 }
  0x4b   :  { %461 = vmatprep.subr.bf16.mxu1 %v628_v0  ;;  %476 = vmatpush3.bf16.msra.mxu0 %v513_v16 }
  0x4c   :  { %477 = vmatprep.subr.bf16.mxu0 %v628_v0 }
  0x4e   :  { %462 = vmatpush3.bf16.msra.mxu1 %v508_v11 }
  0x4f   :  { %463 = vmatprep.subr.bf16.mxu1 %v628_v0  ;;  %478 = vmatpush3.bf16.msra.mxu0 %v514_v17 }
  0x50   :  { %479 = vmatprep.subr.bf16.mxu0 %v628_v0 }
  0x52   :  { %464 = vmatpush3.bf16.msra.mxu1 %v509_v12 }
  0x53   :  { %465 = vmatprep.subr.bf16.mxu1 %v628_v0  ;;  %480 = vmatpush3.bf16.msra.mxu0 %v515_v18 }
  0x54   :  { %481 = vmatprep.subr.bf16.mxu0 %v628_v0 }
  0x56   :  { %466 = vmatpush3.bf16.msra.mxu1 %v510_v13 }
  0x57   :  { %482 = vmatpush3.bf16.msra.mxu0 %v516_v19 }
  0x58   :  { %483 = vmatprep.subr.bf16.mxu0 %v628_v0 }
  0x5b   :  { %484 = vmatpush3.bf16.msra.mxu0 %v517_v34 }
  0x5c   :  { %485 = vmatprep.subr.bf16.mxu0 %v628_v0 }
  0x5f   :  { %486 = vmatpush3.bf16.msra.mxu0 %v518_v35 }
 0x114   :  { %v122_v25 = vpop.f32.mrb[0].mxu0 }
 0x115   :  { %v123_v26 = vadd.f32 %v122_v25, %v71_v24  ;;  %v449_v27 = vpop.f32.mrb[1].mxu0 }
 0x116   :  { %v125_v28 = vpop.f32.mrb[2].mxu0 }
 0x117   :  { %v126_v29 = vadd.f32 %v125_v28, %v71_v24  ;;  %v450_v30 = vpop.f32.mrb[3].mxu0  ;;  %v129_v31 = vmax.f32 %v123_v26, 0.0 }
 0x119   :  { %v130_v32 = vmax.f32 %v126_v29, 0.0 }
 0x11b   :  { %v131_v33 = vpack.c.bf16 %v130_v32, %v129_v31 }
 0x11d   :  { %468 = vmatmul.mubr.bf16.vlgmr.msra.gmra.mrb[0].mxu1 %v131_v33 }
 0x1f0   :  { %v234_v38 = vpop.f32.mrb[0].mxu1 }
 0x1f1   :  { %v235_v39 = vadd.f32 %v234_v38, %v151_v37  ;;  %v469_v40 = vpop.f32.mrb[1].mxu1 }
 0x1f2   :  { %v237_v41 = vpop.f32.mrb[2].mxu1 }
 0x1f3   :  { %v238_v42 = vadd.f32 %v237_v41, %v151_v37  ;;  %v470_v43 = vpop.f32.mrb[3].mxu1  ;;  %v241_v44 = vmax.f32 %v235_v39, 0.0 }
 0x1f5   :  { %v242_v45 = vmax.f32 %v238_v42, 0.0 }
 0x1f7   :  { %v243_v46 = vpack.c.bf16 %v242_v45, %v241_v44 }
 0x1f9   :  { %488 = vmatmul.mubr.bf16.vlgmr.msra.gmra.mrb[4].mxu0 %v243_v46 }
 0x2cc   :  { %v347_v49 = vpop.f32.mrb[4].mxu0 }
 0x2cd   :  { %v348_v50 = vadd.f32 %v347_v49, %v264_v48  ;;  %v489_v51 = vpop.f32.mrb[5].mxu0 }
 0x2ce   :  { %v350_v52 = vpop.f32.mrb[6].mxu0 }
 0x2cf   :  { %v356_v53 = vmin.f32 %v348_v50, 20.0  ;;  %v351_v54 = vadd.f32 %v350_v52, %v264_v48  ;;  %v490_v55 = vpop.f32.mrb[7].mxu0  ;;  %vm354_vm4 = vcmp.gt.f32.partialorder %v348_v50, 20.0 }
 0x2d1   :  { %v358_v56 = vmul.f32 1.442695, %v356_v53  ;;  %v357_v57 = vmin.f32 %v351_v54, 20.0  ;;  %vm355_vm6 = vcmp.gt.f32.partialorder %v351_v54, 20.0 }
 0x2d3   :  { %519 = vpow2.f32 %v358_v56  ;;  %v360_v58 = vmul.f32 1.442695, %v357_v57 }
 0x2d5   :  { %521 = vpow2.f32 %v360_v58 }
 0x2dd   :  { %v520_v59 = vpop.eup %519 }
 0x2de   :  { %v362_v60 = vadd.f32 1.0, %v520_v59  ;;  %v365_v63 = vmul.f32 -0.5, %v520_v59  ;;  %v368_v2 = vand.u32 2147483647, %v520_v59 }
 0x2df   :  { %v522_v61 = vpop.eup %521 }
 0x2e0   :  { %523 = vlog2.f32 %v362_v60  ;;  %v371_v62 = vadd.f32 1.0, %v522_v61  ;;  %v374_v0 = vmul.f32 -0.5, %v522_v61  ;;  %v366_v1 = vadd.f32 1.0, %v365_v63 }
 0x2e1   :  { %v377_v5 = vand.u32 2147483647, %v522_v61  ;;  %vm369_vm2 = vcmp.lt.f32.partialorder %v368_v2, 0.0004427343 }
 0x2e2   :  { %525 = vlog2.f32 %v371_v62  ;;  %v375_v3 = vadd.f32 1.0, %v374_v0  ;;  %v367_v7 = vmul.f32 %v520_v59, %v366_v1 }
 0x2e3   :  { %vm378_vm5 = vcmp.lt.f32.partialorder %v377_v5, 0.0004427343 }
 0x2e4   :  { %v376_v11 = vmul.f32 %v522_v61, %v375_v3 }
 0x2ea   :  { %v524_v4 = vpop.eup %523 }
 0x2eb   :  { %v364_v6 = vmul.f32 0.6931472, %v524_v4 }
 0x2ec   :  { %v526_v8 = vpop.eup %525 }
 0x2ed   :  { %v370_v9 = vsel %vm369_vm2, %v367_v7, %v364_v6  ;;  %v373_v10 = vmul.f32 0.6931472, %v526_v8 }
 0x2ee   :  { %v380_v12 = vsel %vm354_vm4, %v348_v50, %v370_v9 }
 0x2ef   :  { %v379_v13 = vsel %vm378_vm5, %v376_v11, %v373_v10  ;;  %383 = vst.msk [vmem:[#allocation8] sm:$0xff] %vm382_vm3, %v380_v12 }
 0x2f0   :  { %v381_v14 = vsel %vm355_vm6, %v351_v54, %v379_v13 }
 0x2f1   :  { %384 = vst.msk [vmem:[#allocation8 + $0x8] sm:$0xff] %vm382_vm3, %v381_v14 }
 0x2f2   :  { %604 = shalt.err (!%p601_p0)
}
 0x2f3   :  { %s605_s6 = scalar_lea.hbm %s747_s4, 256 }
 0x2f4   :  { %p606_p1 = scmp.ne.s32.totalorder %s747_s4, %s605_s6  ;;  %p609_p2 = scmp.lt.u32.totalorder %s605_s6, %s747_s4 }
 0x2f6   :  { %p611_p3 = pnand %p609_p2, %p606_p1 }
 0x2f8   :  { %614 = shalt.err (!%p611_p3)
}
 0x2f9   :  { %396 = dma.vmem_to_hbm [thread:$0]  %s391_s26, 256, %s747_s4, [#allocation4], %s625_s1, %s625_s1, %s626_s13  }
 0x2fa   :  { %619 = dma.done.wait [#allocation4], 256  }
 0x2fb   :  { %620 = vsyncadd [#allocation4], 4294967040 }
 0x2fc   :  { %400 = vsyncpa [#allocation3], 1 }
 0x2fd   :  { %401 = vsyncpa [#allocation6], 1 }
 0x2fe   :  { %402 = vsyncpa [#allocation4], 1 }

</bundles_post_ra>
